<compile_context>
chip_gen: v7x
topology: tpu7x:2x2x1
jax: 0.10.0
libtpu: 0.0.40
codegen_flags: <defaults>
</compile_context>

<pallas_src>
import jax
import jax.numpy as jnp
from jax.experimental import pallas as pl
from jax.experimental.pallas import tpu as pltpu


def make_logreg_kernel(alpha: float, beta: float):
    """Kernel body with alpha/beta baked in as compile-time scalars."""
    neg_scale = float(1.0 - 2.0 * alpha)   # used where z < 0
    pos_scale = float(1.0 - 2.0 * beta)    # used where z >= 0

    def kernel(x_ref, w_ref, b_ref, o_ref):
        # x_ref: (block_rows, lane)  w_ref: (lane, fold)  b_ref: (1,1) in SMEM
        # o_ref: (block_rows, fold)
        z = jnp.dot(x_ref[...], w_ref[...],
                    preferred_element_type=jnp.float32) + b_ref[0, 0]
        scale = jnp.where(z < 0.0, neg_scale, pos_scale)   # one select
        o_ref[...] = (jnp.tanh(z) * scale).astype(o_ref.dtype)

    return kernel


def _round_up(v: int, m: int) -> int:
    return -(-v // m) * m


def logistic_regression_forward(x, weight, bias, alpha, beta, *, block_n=1024):
    """x: (N, D) f32; weight: (1, D) f32 (PyTorch nn.Linear layout); bias: (1,)."""
    N, D = x.shape
    x = x.astype(jnp.float32)

    # Fold the (small) feature dim into the 128-lane dimension when possible.
    fold = 128 // D if (D <= 128 and 128 % D == 0) else 1
    lane = D * fold

    rows_total = -(-N // fold)                                   # folded rows
    block_rows = max(8, _round_up(max(block_n // fold, 1), 8))   # big tile
    block_rows = min(block_rows, _round_up(rows_total, 8))       # don't overshoot
    num_blocks = -(-rows_total // block_rows)
    rows_pad = num_blocks * block_rows
    n_pad = rows_pad * fold

    # Zero-pad ragged batch; padded rows are dropped after the call.
    x_pad = jnp.pad(x, ((0, n_pad - N), (0, 0))) if n_pad != N else x
    x_fold = x_pad.reshape(rows_pad, lane)

    # Block-diagonal weight: column k carries w in rows k*D .. k*D + D - 1,
    # so (x_fold @ w_bd)[r, k] == x[fold*r + k, :] @ w.
    w = weight.reshape(D).astype(jnp.float32)
    w_bd = (jnp.eye(fold, dtype=jnp.float32)[:, None, :]
            * w[None, :, None]).reshape(lane, fold)

    b2 = bias.reshape(1, 1).astype(jnp.float32)

    kernel = make_logreg_kernel(alpha, beta)

    out_fold = pl.pallas_call(
        kernel,
        out_shape=jax.ShapeDtypeStruct((rows_pad, fold), jnp.float32),
        grid_spec=pltpu.PrefetchScalarGridSpec(
            num_scalar_prefetch=0,
            grid=(num_blocks,),
            in_specs=[
                pl.BlockSpec((block_rows, lane), lambda i: (i, 0)),    # x tile
                pl.BlockSpec((lane, fold), lambda i: (0, 0)),          # weights (resident)
                pl.BlockSpec(memory_space=pltpu.MemorySpace.SMEM),     # bias scalar
            ],
            out_specs=pl.BlockSpec((block_rows, fold), lambda i: (i, 0)),
        ),
        compiler_params=pltpu.CompilerParams(
            dimension_semantics=("parallel",),   # megacore shards the batch axis
        ),
        cost_estimate=pl.CostEstimate(
            flops=2 * rows_pad * lane * fold,
            transcendentals=rows_pad * fold,
            bytes_accessed=rows_pad * lane * 4 + rows_pad * fold * 4 + lane * fold * 4,
        ),
    )(x_fold, w_bd, b2)

    return out_fold.reshape(n_pad, 1)[:N]


def reference_forward(x, weight, bias, alpha, beta):
    z = x @ weight.T + bias
    return jnp.where(z < 0, jnp.tanh(z) * (1 - 2 * alpha),
                     jnp.tanh(z) * (1 - 2 * beta))


if __name__ == "__main__":
    # Module hyperparameters (deterministic, synthetic).
    input_dim = 32
    alpha = 0.1
    beta = 0.2

    key = jax.random.PRNGKey(0)
    kx, kw, kb = jax.random.split(key, 3)

    # Deterministic "parameter init" matching nn.Linear(input_dim, 1) shapes.
    weight = jax.random.normal(kw, (1, input_dim), dtype=jnp.float32) * 0.1
    bias = jax.random.normal(kb, (1,), dtype=jnp.float32) * 0.1

    ok = True
    # batch=10 exercises the ragged/padded path; batch=1056 exercises a
    # multi-block grid with large tiles.  Both are still tiny arrays.
    for batch in (10, 1056):
        xb = jax.random.normal(kx, (batch, input_dim), dtype=jnp.float32)
        out = jax.block_until_ready(
            logistic_regression_forward(xb, weight, bias, alpha, beta))
        ref = reference_forward(xb, weight, bias, alpha, beta)
        ok = ok and (out.shape == (batch, 1)) and bool(
            jnp.allclose(out, ref, atol=1e-5, rtol=1e-5))

    if not ok:
        raise SystemExit("kernel output mismatch vs reference")
    print("KERNEL_OK")
</pallas_src>

<mosaic_0001>
module attributes {stable_mosaic.version = 11 : i64} {
  func.func @kernel(%arg0: i32, %arg1: memref<8x128xf32, #tpu.memory_space<vmem>>, %arg2: memref<128x4xf32, #tpu.memory_space<vmem>>, %arg3: memref<1x1xf32, #tpu.memory_space<smem>>, %arg4: memref<8x4xf32, #tpu.memory_space<vmem>>) attributes {dimension_semantics = [#tpu.dimension_semantics<parallel>], iteration_bounds = array<i64: 1>, scalar_prefetch = 0 : i64, scratch_operands = 0 : i64, tpu.core_type = #tpu.core_type<tc>, window_params = [{transform_indices = @transform_0, window_bounds = array<i64: 8, 128>}, {pipeline_mode = #tpu.pipeline_mode<synchronous>, transform_indices = @transform_1, window_bounds = array<i64: 128, 4>}, {transform_indices = @transform_2, window_bounds = array<i64: 1, 1>}, {transform_indices = @transform_3, window_bounds = array<i64: 8, 4>}]} {
    %c0 = arith.constant 0 : index
    %c0_0 = arith.constant 0 : index
    %0 = vector.load %arg1[%c0, %c0_0] : memref<8x128xf32, #tpu.memory_space<vmem>>, vector<8x128xf32>
    %c0_1 = arith.constant 0 : index
    %c0_2 = arith.constant 0 : index
    %1 = vector.load %arg2[%c0_1, %c0_2] : memref<128x4xf32, #tpu.memory_space<vmem>>, vector<128x4xf32>
    %cst = arith.constant dense<0.000000e+00> : vector<8x4xf32>
    %2 = tpu.matmul %0, %1, %cst {dimension_numbers = #tpu.dot_dimension_numbers<[1], [0], [0], [1], [0, 0, 1, 1], [], []>} : vector<8x128xf32>, vector<128x4xf32>, vector<8x4xf32> -> vector<8x4xf32>
    %c0_3 = arith.constant 0 : index
    %c0_4 = arith.constant 0 : index
    %3 = memref.load %arg3[%c0_3, %c0_4] : memref<1x1xf32, #tpu.memory_space<smem>>
    %4 = vector.broadcast %3 : f32 to vector<8x4xf32>
    %5 = arith.addf %2, %4 : vector<8x4xf32>
    %cst_5 = arith.constant 0.000000e+00 : f32
    %6 = vector.broadcast %cst_5 : f32 to vector<8x4xf32>
    %7 = arith.cmpf olt, %5, %6 : vector<8x4xf32>
    %cst_6 = arith.constant 8.000000e-01 : f32
    %cst_7 = arith.constant 6.000000e-01 : f32
    %8 = vector.broadcast %cst_6 : f32 to vector<8x4xf32>
    %9 = vector.broadcast %cst_7 : f32 to vector<8x4xf32>
    %10 = arith.select %7, %8, %9 : vector<8x4xi1>, vector<8x4xf32>
    %11 = math.tanh %5 : vector<8x4xf32>
    %12 = arith.mulf %11, %10 : vector<8x4xf32>
    %c0_8 = arith.constant 0 : index
    %c0_9 = arith.constant 0 : index
    %13 = vector.load %arg4[%c0_8, %c0_9] : memref<8x4xf32, #tpu.memory_space<vmem>>, vector<8x4xf32>
    tpu.vector_store %arg4[%c0_8, %c0_9], %12 {strides = array<i32>} : memref<8x4xf32, #tpu.memory_space<vmem>>, vector<8x4xf32>,
    return
  }
  func.func @transform_0(%arg0: i32) -> (i32, i32) {
    %c0_i32 = arith.constant 0 : i32
    %c0_i32_0 = arith.constant 0 : i32
    return %arg0, %c0_i32 : i32, i32
  }
  func.func @transform_1(%arg0: i32) -> (i32, i32) {
    %c0_i32 = arith.constant 0 : i32
    %c0_i32_0 = arith.constant 0 : i32
    %c0_i32_1 = arith.constant 0 : i32
    return %c0_i32, %c0_i32_0 : i32, i32
  }
  func.func @transform_2(%arg0: i32) -> (i32, i32) {
    %c0_i32 = arith.constant 0 : i32
    %c0_i32_0 = arith.constant 0 : i32
    %c0_i32_1 = arith.constant 0 : i32
    return %c0_i32, %c0_i32_0 : i32, i32
  }
  func.func @transform_3(%arg0: i32) -> (i32, i32) {
    %c0_i32 = arith.constant 0 : i32
    %c0_i32_0 = arith.constant 0 : i32
    return %arg0, %c0_i32 : i32, i32
  }
}

</mosaic_0001>

<bundles_post_ra>
// kernel: tpu_custom_call.1
= control target key start
LH: loop header
LB: loop body
LE: loop exit
PB: predicated region body
PF: predicated region fallthrough
CT: control target
= control target key end

     0   :  { %v196_v0 = vmov 0.0|0.0   ;;  %vm197_vm0 = vmmov 0   ;;  %v198_v4 = vmov 0.0   ;;  %v199_v32 = vmov 0.6   ;;  %s277_s1 = inlined_call_operand.vmem [shape: f32[128,4], index: 1, kind: input, shape index: {}]   ;;  %s278_s0 = inlined_call_operand.vmem [shape: f32[8,128], index: 0, kind: input, shape index: {}]   ;;  %s279_s2 = inlined_call_operand.<no memory space> [shape: f32[1,1], index: 2, kind: input, shape index: {}]   ;;  %s280_s3 = inlined_call_operand.vmem [shape: f32[8,4], index: 3, kind: output, shape index: {}]  }
   0x1   :  { %166 = vmatprep.subr.bf16.mxu0 %v196_v0  ;;  %v16_v1 = vld [vmem:[%s277_s1] sm:$0xff]  ;;  %v17_v2 = vld [vmem:[%s277_s1 + $0x8] sm:$0xff]  ;;  %v18_v3 = vld [vmem:[%s277_s1 + $0x10] sm:$0xff]  ;;  %163 = vmatprep.mubr.msk.f32.mxu0 %vm197_vm0, %v198_v4  ;;  %v33_v27 = vstv %s279_s2  ;;  %vm108_vm2 = vcmask 31744  }
   0x2   :  { %v167_v5 = vpack.c.bf16 %v17_v2, %v16_v1  ;;  %v19_v6 = vld [vmem:[%s277_s1 + $0x18] sm:$0xff]  ;;  %v20_v8 = vld [vmem:[%s277_s1 + $0x20] sm:$0xff]  ;;  %v21_v9 = vld [vmem:[%s277_s1 + $0x28] sm:$0xff] }
   0x3   :  { %v170_v7 = vpack.c.bf16 %v19_v6, %v18_v3  ;;  %v173_v10 = vpack.c.bf16 %v21_v9, %v20_v8  ;;  %v22_v11 = vld [vmem:[%s277_s1 + $0x30] sm:$0xff]  ;;  %v23_v12 = vld [vmem:[%s277_s1 + $0x38] sm:$0xff]  ;;  %v24_v14 = vld [vmem:[%s277_s1 + $0x40] sm:$0xff] }
   0x4   :  { %168 = vmatpush3.bf16.msra.mxu0 %v167_v5  ;;  %v176_v13 = vpack.c.bf16 %v23_v12, %v22_v11  ;;  %v25_v15 = vld [vmem:[%s277_s1 + $0x48] sm:$0xff]  ;;  %v26_v17 = vld [vmem:[%s277_s1 + $0x50] sm:$0xff]  ;;  %v27_v18 = vld [vmem:[%s277_s1 + $0x58] sm:$0xff] }
   0x5   :  { %169 = vmatprep.subr.bf16.mxu0 %v196_v0  ;;  %v179_v16 = vpack.c.bf16 %v25_v15, %v24_v14  ;;  %v182_v19 = vpack.c.bf16 %v27_v18, %v26_v17  ;;  %v28_v20 = vld [vmem:[%s277_s1 + $0x60] sm:$0xff]  ;;  %v29_v21 = vld [vmem:[%s277_s1 + $0x68] sm:$0xff]  ;;  %v30_v23 = vld [vmem:[%s277_s1 + $0x70] sm:$0xff] }
   0x6   :  { %v185_v22 = vpack.c.bf16 %v29_v21, %v28_v20  ;;  %v31_v24 = vld [vmem:[%s277_s1 + $0x78] sm:$0xff]  ;;  %v15_v26 = vld [vmem:[%s278_s0] sm:$0xff] }
   0x7   :  { %v188_v25 = vpack.c.bf16 %v31_v24, %v30_v23 }
   0x8   :  { %171 = vmatpush3.bf16.msra.mxu0 %v170_v7 }
   0x9   :  { %172 = vmatprep.subr.bf16.mxu0 %v196_v0 }
   0xc   :  { %174 = vmatpush3.bf16.msra.mxu0 %v173_v10 }
   0xd   :  { %175 = vmatprep.subr.bf16.mxu0 %v196_v0 }
  0x10   :  { %177 = vmatpush3.bf16.msra.mxu0 %v176_v13 }
  0x11   :  { %178 = vmatprep.subr.bf16.mxu0 %v196_v0 }
  0x14   :  { %180 = vmatpush3.bf16.msra.mxu0 %v179_v16 }
  0x15   :  { %181 = vmatprep.subr.bf16.mxu0 %v196_v0 }
  0x18   :  { %183 = vmatpush3.bf16.msra.mxu0 %v182_v19 }
  0x19   :  { %184 = vmatprep.subr.bf16.mxu0 %v196_v0 }
  0x1c   :  { %186 = vmatpush3.bf16.msra.mxu0 %v185_v22 }
  0x1d   :  { %187 = vmatprep.subr.bf16.mxu0 %v196_v0 }
  0x20   :  { %189 = vmatpush3.bf16.msra.mxu0 %v188_v25 }
  0x23   :  { %164 = vmatmul.mubr.f32.vlgmr.msra.gmra.mrb[0].mxu0 %v15_v26 }
  0xf6   :  { %v100_v28 = vpop.f32.mrb[0].mxu0 }
  0xf7   :  { %v101_v29 = vadd.f32 %v100_v28, %v33_v27  ;;  %v165_v30 = vpop.f32.mrb[1].mxu0 }
  0xf9   :  { %194 = vtanh.f32 %v101_v29  ;;  %vm104_vm1 = vcmp.lt.f32.partialorder %v101_v29, 0.0 }
  0xfa   :  { %v105_v33 = vsel %vm104_vm1, 0.8, %v199_v32 }
 0x103   :  { %v195_v31 = vpop.eup %194 }
 0x104   :  { %v107_v34 = vmul.f32 %v195_v31, %v105_v33 }
 0x106   :  { %109 = vst.msk [vmem:[%s280_s3] sm:$0xff] %vm108_vm2, %v107_v34 }

</bundles_post_ra>
